<compile_context>
chip_gen: v7x
topology: tpu7x:2x2x1
jax: 0.10.0
libtpu: 0.0.40
codegen_flags: <defaults>
</compile_context>

<pallas_src>
import jax
import jax.numpy as jnp
from jax.experimental import pallas as pl
from jax.experimental.pallas import tpu as pltpu


def mlp_kernel(x_ref, w1_ref, b1_ref, w2_ref, b2_ref, o_ref):
    # fc1 on the MXU: (TB, D) @ (D, H) -> (TB, H), f32 accumulation.
    h = jnp.dot(x_ref[...], w1_ref[...], preferred_element_type=jnp.float32)
    # bias + ReLU on the VPU.
    h = jnp.maximum(h + b1_ref[...], 0.0)
    # fc2 output width is 1 -> VPU multiply + XLU lane reduce instead of a
    # degenerate N=1 MXU matmul.  w2_ref is stored as a (1, H) row vector.
    y = jnp.sum(h * w2_ref[...], axis=-1, keepdims=True)            # (TB, 1)
    # scalar bias from SMEM (rides the scalar slot).
    y = y + b2_ref[0, 0]
    # sigmoid via EUP tanh: 0.5 * (1 + tanh(y/2)).
    s = 0.5 * (1.0 + jnp.tanh(0.5 * y))                              # (TB, 1)
    # Lane-dense store: one XLU transpose to a (1, TB) row -> no 128x output
    # write amplification; unmasked vst whenever TB is a multiple of 128.
    o_ref[...] = jnp.transpose(s).astype(o_ref.dtype)               # (1, TB)


def _round_up(n, m):
    return ((n + m - 1) // m) * m


def mlp_forward(x, w1, b1, w2, b2, *, block_b=1024):
    """x: (B, D); w1: (D, H); b1: (H,) or (1, H); w2: (H, 1); b2: (1,)/(1,1)."""
    B, D = x.shape
    H = w1.shape[1]
    f32 = jnp.float32

    # "Weight prep" is only free reshapes/casts — no zero-padding, no
    # dynamic-update-slice.  (If weights are reused across many calls, hoist
    # these three lines into a one-time prep step.)
    x = x.astype(f32)
    w1 = w1.astype(f32)
    b1r = jnp.reshape(b1, (1, H)).astype(f32)
    w2r = jnp.reshape(w2, (1, H)).astype(f32)     # (H, 1) -> (1, H), data is contiguous
    b2r = jnp.reshape(b2, (1, 1)).astype(f32)

    # Batch tile: multiple of 8; for larger B pick a multiple of 128 (unmasked
    # lane-dense output stores) and make sure the grid has >= 2 parallel steps
    # so both v7x TensorCores are fed; cap at block_b to amortize the
    # ~0.35us/step grid overhead without blowing VMEM.
    block_b = _round_up(max(block_b, 8), 8)
    if B <= 128:
        TB = _round_up(B, 8)
    else:
        TB = min(block_b, _round_up(pl.cdiv(B, 2), 128))
    nb = pl.cdiv(B, TB)

    out = pl.pallas_call(
        mlp_kernel,
        out_shape=jax.ShapeDtypeStruct((nb, 1, TB), f32),
        grid_spec=pltpu.PrefetchScalarGridSpec(
            num_scalar_prefetch=0,
            grid=(nb,),
            in_specs=[
                # x tiled over batch; full-D block => no feature padding. The
                # last batch block may be ragged; its garbage rows only affect
                # output rows that the wrapper slices off.
                pl.BlockSpec((TB, D), lambda i: (i, 0)),
                # Weights resident across the whole grid (constant index_map).
                # TODO(synk): for large D*H (>~16 MiB) add an "arbitrary" K grid
                # axis + VMEM accumulator instead of keeping W1 whole (v7x VMEM
                # is 64 MiB physical / 32 MiB scoped default).
                pl.BlockSpec((D, H), lambda i: (0, 0)),
                pl.BlockSpec((1, H), lambda i: (0, 0)),
                pl.BlockSpec((1, H), lambda i: (0, 0)),
                # b2 scalar lives in SMEM.
                pl.BlockSpec(memory_space=pltpu.MemorySpace.SMEM),
            ],
            # One lane-dense (1, TB) row per grid step (leading block dim squeezed).
            out_specs=pl.BlockSpec((None, 1, TB), lambda i: (i, 0, 0)),
        ),
        compiler_params=pltpu.CompilerParams(
            dimension_semantics=("parallel",),
        ),
        cost_estimate=pl.CostEstimate(
            flops=2 * nb * TB * D * H + 4 * nb * TB * H,
            transcendentals=nb * TB,
            bytes_accessed=4 * (B * D + D * H + 2 * H + 1 + nb * TB),
        ),
    )(x, w1, b1r, w2r, b2r)

    # (nb, 1, TB) -> (B, 1): drop the padded rows of the ragged last block.
    return out.reshape(nb * TB, 1)[:B]


if __name__ == "__main__":
    # Small shapes consistent with the module: batch=8, input_size=32, hidden_size1=16.
    B, INPUT_SIZE, HIDDEN1 = 8, 32, 16

    key = jax.random.PRNGKey(0)
    kx, kw1, kb1, kw2, kb2 = jax.random.split(key, 5)

    x = jax.random.normal(kx, (B, INPUT_SIZE), dtype=jnp.float32)

    # PyTorch Linear weight is (out, in); we store the transpose (in, out) so
    # the kernel computes a plain x @ W.  Biases match nn.Linear shapes.
    w1 = jax.random.normal(kw1, (INPUT_SIZE, HIDDEN1), dtype=jnp.float32) * 0.1
    b1 = jax.random.normal(kb1, (HIDDEN1,), dtype=jnp.float32) * 0.1
    w2 = jax.random.normal(kw2, (HIDDEN1, 1), dtype=jnp.float32) * 0.1
    b2 = jax.random.normal(kb2, (1,), dtype=jnp.float32) * 0.1

    out = mlp_forward(x, w1, b1, w2, b2)
    out = jax.block_until_ready(out)

    # Reference (same math as the PyTorch forward).
    ref = jax.nn.sigmoid(
        jnp.maximum(x @ w1 + b1.reshape(1, -1), 0.0) @ w2 + b2.reshape(1, 1)
    )
    assert out.shape == (B, 1)
    assert jnp.allclose(out, ref, atol=1e-5, rtol=1e-5)

    print("KERNEL_OK")
</pallas_src>

<mosaic_0001>
module attributes {stable_mosaic.version = 11 : i64} {
  func.func @mlp_kernel(%arg0: i32, %arg1: memref<8x32xf32, #tpu.memory_space<vmem>>, %arg2: memref<32x16xf32, #tpu.memory_space<vmem>>, %arg3: memref<1x16xf32, #tpu.memory_space<vmem>>, %arg4: memref<1x16xf32, #tpu.memory_space<vmem>>, %arg5: memref<1x1xf32, #tpu.memory_space<smem>>, %arg6: memref<1x1x8xf32, #tpu.memory_space<vmem>>) attributes {dimension_semantics = [#tpu.dimension_semantics<parallel>], iteration_bounds = array<i64: 1>, scalar_prefetch = 0 : i64, scratch_operands = 0 : i64, tpu.core_type = #tpu.core_type<tc>, window_params = [{transform_indices = @transform_0, window_bounds = array<i64: 8, 32>}, {pipeline_mode = #tpu.pipeline_mode<synchronous>, transform_indices = @transform_1, window_bounds = array<i64: 32, 16>}, {pipeline_mode = #tpu.pipeline_mode<synchronous>, transform_indices = @transform_2, window_bounds = array<i64: 1, 16>}, {pipeline_mode = #tpu.pipeline_mode<synchronous>, transform_indices = @transform_3, window_bounds = array<i64: 1, 16>}, {transform_indices = @transform_4, window_bounds = array<i64: 1, 1>}, {transform_indices = @transform_5, window_bounds = array<i64: 1, 1, 8>}]} {
    %c0 = arith.constant 0 : index
    %c0_0 = arith.constant 0 : index
    %0 = vector.load %arg1[%c0, %c0_0] : memref<8x32xf32, #tpu.memory_space<vmem>>, vector<8x32xf32>
    %c0_1 = arith.constant 0 : index
    %c0_2 = arith.constant 0 : index
    %1 = vector.load %arg2[%c0_1, %c0_2] : memref<32x16xf32, #tpu.memory_space<vmem>>, vector<32x16xf32>
    %cst = arith.constant dense<0.000000e+00> : vector<8x16xf32>
    %2 = tpu.matmul %0, %1, %cst {dimension_numbers = #tpu.dot_dimension_numbers<[1], [0], [0], [1], [0, 0, 1, 1], [], []>} : vector<8x32xf32>, vector<32x16xf32>, vector<8x16xf32> -> vector<8x16xf32>
    %c0_3 = arith.constant 0 : index
    %c0_4 = arith.constant 0 : index
    %3 = vector.load %arg3[%c0_3, %c0_4] : memref<1x16xf32, #tpu.memory_space<vmem>>, vector<1x16xf32>
    %4 = vector.broadcast %3 : vector<1x16xf32> to vector<8x16xf32>
    %5 = arith.addf %2, %4 : vector<8x16xf32>
    %cst_5 = arith.constant 0.000000e+00 : f32
    %6 = vector.broadcast %cst_5 : f32 to vector<8x16xf32>
    %7 = arith.maximumf %5, %6 : vector<8x16xf32>
    %c0_6 = arith.constant 0 : index
    %c0_7 = arith.constant 0 : index
    %8 = vector.load %arg4[%c0_6, %c0_7] : memref<1x16xf32, #tpu.memory_space<vmem>>, vector<1x16xf32>
    %9 = vector.broadcast %8 : vector<1x16xf32> to vector<8x16xf32>
    %10 = arith.mulf %7, %9 : vector<8x16xf32>
    %cst_8 = arith.constant dense<0.000000e+00> : vector<8xf32>
    %11 = vector.multi_reduction <add>, %10, %cst_8 [1] : vector<8x16xf32> to vector<8xf32>
    %12 = vector.shape_cast %11 : vector<8xf32> to vector<8x1xf32>
    %c0_9 = arith.constant 0 : index
    %c0_10 = arith.constant 0 : index
    %13 = memref.load %arg5[%c0_9, %c0_10] : memref<1x1xf32, #tpu.memory_space<smem>>
    %14 = vector.broadcast %13 : f32 to vector<8x1xf32>
    %15 = arith.addf %12, %14 : vector<8x1xf32>
    %cst_11 = arith.constant 5.000000e-01 : f32
    %16 = vector.broadcast %cst_11 : f32 to vector<8x1xf32>
    %17 = arith.mulf %16, %15 : vector<8x1xf32>
    %18 = math.tanh %17 : vector<8x1xf32>
    %cst_12 = arith.constant 1.000000e+00 : f32
    %19 = vector.broadcast %cst_12 : f32 to vector<8x1xf32>
    %20 = arith.addf %19, %18 : vector<8x1xf32>
    %cst_13 = arith.constant 5.000000e-01 : f32
    %21 = vector.broadcast %cst_13 : f32 to vector<8x1xf32>
    %22 = arith.mulf %21, %20 : vector<8x1xf32>
    %23 = tpu.transpose %22, [1, 0] : vector<8x1xf32> -> vector<1x8xf32>
    %c0_14 = arith.constant 0 : index
    %c0_15 = arith.constant 0 : index
    %c0_16 = arith.constant 0 : index
    %24 = vector.load %arg6[%c0_14, %c0_15, %c0_16] : memref<1x1x8xf32, #tpu.memory_space<vmem>>, vector<1x1x8xf32>
    %25 = vector.shape_cast %24 : vector<1x1x8xf32> to vector<1x8xf32>
    %26 = vector.shape_cast %23 : vector<1x8xf32> to vector<1x1x8xf32>
    tpu.vector_store %arg6[%c0_14, %c0_15, %c0_16], %26 {strides = array<i32>} : memref<1x1x8xf32, #tpu.memory_space<vmem>>, vector<1x1x8xf32>,
    return
  }
  func.func @transform_0(%arg0: i32) -> (i32, i32) {
    %c0_i32 = arith.constant 0 : i32
    %c0_i32_0 = arith.constant 0 : i32
    return %arg0, %c0_i32 : i32, i32
  }
  func.func @transform_1(%arg0: i32) -> (i32, i32) {
    %c0_i32 = arith.constant 0 : i32
    %c0_i32_0 = arith.constant 0 : i32
    %c0_i32_1 = arith.constant 0 : i32
    return %c0_i32, %c0_i32_0 : i32, i32
  }
  func.func @transform_2(%arg0: i32) -> (i32, i32) {
    %c0_i32 = arith.constant 0 : i32
    %c0_i32_0 = arith.constant 0 : i32
    %c0_i32_1 = arith.constant 0 : i32
    return %c0_i32, %c0_i32_0 : i32, i32
  }
  func.func @transform_3(%arg0: i32) -> (i32, i32) {
    %c0_i32 = arith.constant 0 : i32
    %c0_i32_0 = arith.constant 0 : i32
    %c0_i32_1 = arith.constant 0 : i32
    return %c0_i32, %c0_i32_0 : i32, i32
  }
  func.func @transform_4(%arg0: i32) -> (i32, i32) {
    %c0_i32 = arith.constant 0 : i32
    %c0_i32_0 = arith.constant 0 : i32
    %c0_i32_1 = arith.constant 0 : i32
    return %c0_i32, %c0_i32_0 : i32, i32
  }
  func.func @transform_5(%arg0: i32) -> (i32, i32, i32) {
    %c0_i32 = arith.constant 0 : i32
    %c0_i32_0 = arith.constant 0 : i32
    %c0_i32_1 = arith.constant 0 : i32
    return %arg0, %c0_i32, %c0_i32_0 : i32, i32, i32
  }
}

</mosaic_0001>

<bundles_post_ra>
// kernel: tpu_custom_call.1
= control target key start
LH: loop header
LB: loop body
LE: loop exit
PB: predicated region body
PF: predicated region fallthrough
CT: control target
= control target key end

     0   :  { %v231_v3 = vmov 0.0|0.0   ;;  %vm232_vm0 = vmmov 0   ;;  %v233_v6 = vmov 0.0   ;;  %s301_s0 = inlined_call_operand.vmem [shape: f32[8,32], index: 0, kind: input, shape index: {}]   ;;  %s302_s1 = inlined_call_operand.vmem [shape: f32[32,16], index: 1, kind: input, shape index: {}]   ;;  %s303_s2 = inlined_call_operand.vmem [shape: f32[1,16], index: 2, kind: input, shape index: {}]   ;;  %s304_s3 = inlined_call_operand.vmem [shape: f32[1,16], index: 3, kind: input, shape index: {}]   ;;  %s305_s4 = inlined_call_operand.<no memory space> [shape: f32[1,1], index: 4, kind: input, shape index: {}]   ;;  %s306_s5 = inlined_call_operand.hbm [shape: f32[1,1,8], index: 5, kind: output, shape index: {}]  }
   0x1   :  { %v23_v0 = vld [vmem:[%s302_s1] sm:$0xff]  ;;  %v24_v1 = vld [vmem:[%s302_s1 + $0x8] sm:$0xff]  ;;  %v25_v2 = vld [vmem:[%s302_s1 + $0x10] sm:$0xff]  ;;  %195 = vmatprep.subr.bf16.mxu0 %v231_v3  ;;  %192 = vmatprep.mubr.msk.f32.mxu0 %vm232_vm0, %v233_v6 }
   0x2   :  { %v196_v4 = vpack.c.bf16 %v24_v1, %v23_v0  ;;  %v26_v5 = vld [vmem:[%s302_s1 + $0x18] sm:$0xff] }
   0x3   :  { %11 = vsyncpa [#allocation4], 0  ;;  %v199_v7 = vpack.c.bf16 %v26_v5, %v25_v2  ;;  %v22_v8 = vld [vmem:[%s301_s0] sm:$0xff]  ;;  %vm34_vm1 = vcmask 261120   ;;  %vm117_vm2 = vcmask 130048   ;;  %v122_v17 = vstv %s305_s4 }
   0x4   :  { %197 = vmatpush3.bf16.msra.mxu0 %v196_v4  ;;  %v176_v9 = vld [vmem:[%s303_s2] ss:$0 sm:$0xff]  ;;  %s234_s2 = smov [#allocation3]   ;;  %vm160_vm3 = vcmask 57344  }
   0x5   :  { %198 = vmatprep.subr.bf16.mxu0 %v231_v3  ;;  %v178_v13 = vld [vmem:[%s304_s3] ss:$0 sm:$0xff]  ;;  %s168_s7 = sshll.u32 %s234_s2, 4  ;;  %s169_s7 = int_to_ptr.vmem [resolvable:$true] %s168_s7 }
   0x6   :  { %s207_s3 = scalar_lea.vmem %s169_s7, 16  ;;  %s211_s8 = scalar_lea.vmem %s169_s7, 32 }
   0x7   :  { %p208_p0 = scmp.ne.s32.totalorder %s169_s7, %s207_s3  ;;  %p212_p1 = scmp.lt.s32.totalorder %s169_s7, %s169_s7 }
   0x8   :  { %200 = vmatpush3.bf16.msra.mxu0 %v199_v7  ;;  %p213_p2 = scmp.lt.s32.totalorder %s211_s8, %s207_s3 }
   0xa   :  { %p214_p3 = por %p213_p2, %p212_p1 }
   0xb   :  { %193 = vmatmul.mubr.msk.f32.vlgmr.msra.gmra.mrb[0].mxu0 %vm34_vm1, %v22_v8 }
   0xc   :  { %p215_p4 = pnand %p214_p3, %p208_p0 }
  0xde   :  { %v104_v10 = vpop.f32.mrb[0].mxu0 }
  0xdf   :  { %v105_v11 = vadd.f32 %v176_v9, %v104_v10  ;;  %v194_v12 = vpop.f32.mrb[1].mxu0 }
  0xe1   :  { %v108_v14 = vmax.f32 %v105_v11, 0.0 }
  0xe3   :  { %v116_v15 = vmul.f32 %v178_v13, %v108_v14 }
  0xe5   :  { %v118_v16 = vsel %vm117_vm2, %v116_v15, 0.0 }
  0xe6   :  { %119 = vadd.xlane.f32.xlu0 %v118_v16 }
 0x173   :  { %v120_v18 = vpop.xlane.xlu0 %119 }
 0x174   :  { %v123_v19 = vadd.f32 %v122_v17, %v120_v18 }
 0x176   :  { %v124_v20 = vmul.f32 0.5, %v123_v19 }
 0x178   :  { %205 = vtanh.f32 %v124_v20 }
 0x182   :  { %v206_v21 = vpop.eup %205 }
 0x183   :  { %v126_v22 = vadd.f32 1.0, %v206_v21 }
 0x185   :  { %v127_v23 = vmul.f32 0.5, %v126_v22 }
 0x187   :  { %128 = vxpose.xlu0.b32.start.end [1/1] (short) (narrow) %v127_v23, 8 }
 0x207   :  { %v144_v24 = vpop.trf.xlu0 }
 0x208   :  { %161 = vst.msk [vmem:[#allocation3] sm:$0x1] %vm160_vm3, %v144_v24 }
 0x209   :  { %218 = shalt.err (!%p215_p4)
}
 0x20a   :  { %s219_s10 = scalar_lea.hbm %s306_s5, 16 }
 0x20b   :  { %p220_p5 = scmp.ne.s32.totalorder %s306_s5, %s219_s10  ;;  %p223_p6 = scmp.lt.u32.totalorder %s219_s10, %s306_s5 }
 0x20d   :  { %p225_p7 = pnand %p223_p6, %p220_p5 }
 0x20f   :  { %228 = shalt.err (!%p225_p7)
}
 0x210   :  { %171 = dma.vmem_to_hbm [thread:$0]  %s169_s7, 16, %s306_s5, [#allocation4]  }
 0x211   :  { %229 = dma.done.wait [#allocation4], 16  }
 0x212   :  { %230 = vsyncadd [#allocation4], 4294967280 }
 0x213   :  { %175 = vsyncpa [#allocation4], 1 }

</bundles_post_ra>
